<compile_context>
chip_gen: v7x
topology: tpu7x:2x2x1
jax: 0.10.0
libtpu: 0.0.40
codegen_flags: <defaults>
</compile_context>

<pallas_src>
import jax
import jax.numpy as jnp
from jax import lax
from jax.experimental import pallas as pl
from jax.experimental.pallas import tpu as pltpu


# ----------------------------- config (small, synthetic) --------------------
class Config:
    vocab_size = 64
    blocksize = 16
    n_embd = 32


cfg = Config()

_LANE = 128
_SUBLANE = 8
_TM_MAX = 512        # row-tile cap: multiple of 256 -> clean MXU shape on v5e/v6e/v7x
_NEG_INF = -1e30


def _round_up(x, m):
    return (x + m - 1) // m * m


_VMEM_CAP_CACHE = [None]


def _vmem_capacity_bytes():
    """Chip VMEM capacity (v5e/v6e: 128 MiB, v7x: 64 MiB); conservative fallback."""
    if _VMEM_CAP_CACHE[0] is None:
        try:
            _VMEM_CAP_CACHE[0] = int(pltpu.get_tpu_info().vmem_capacity_bytes)
        except Exception:
            _VMEM_CAP_CACHE[0] = 64 * 1024 * 1024
    return _VMEM_CAP_CACHE[0]


def _pick_tile(M, vpad):
    """Row-tile size + tile count, derived from VMEM capacity and the v7x 2-TC rule."""
    usable = int(_vmem_capacity_bytes() * 0.75)
    # Double-buffered f32 logits tile must not exceed ~1/4 of usable scoped VMEM.
    tm_vmem = max(_SUBLANE, (usable // 4 // (2 * vpad * 4)) // _SUBLANE * _SUBLANE)
    tm_cap = min(_TM_MAX, tm_vmem)
    # >= 2 tiles whenever there are >= 2 sublane groups of rows, so both v7x TensorCores
    # get work under dimension_semantics=("parallel",); harmless on v5e/v6e (1 TC).
    n_tiles = max(pl.cdiv(M, tm_cap), 2 if M >= 2 * _SUBLANE else 1)
    tm = _round_up(pl.cdiv(M, n_tiles), _SUBLANE)     # last-tile padding < one sublane group
    return tm, n_tiles


def _vmem_limit_bytes(tm, vpad, vtab):
    """Scoped-VMEM limit from the actual tile footprint (not a fixed band)."""
    per_step = tm * 4 + tm * 4 + tm * vpad * 4 + _SUBLANE * 4   # idx, tgt, logits, ce tiles
    resident = vtab * vpad * 4                                   # fused logit table
    need = 4 * (2 * per_step + 2 * resident) + (2 << 20)         # dbl-buffering + temps + slack
    return int(min(max(need, 8 << 20), int(_vmem_capacity_bytes() * 0.75)))


# ----------------------------- kernels --------------------------------------
def _select_logits(idx_ref, fused_ref):
    """One-hot @ fused-table on the MXU: exact row gather, single matmul pass.

    TODO(synk): for large vocab switch to a scalar-prefetch / DMA row gather so the
    O(tm*V) one-hot never touches the VPU/MXU (matters earliest on v5e), and give the
    resident fused table pipeline_mode=pl.Buffered(1) to halve its VMEM footprint.
    """
    ids = idx_ref[...]                                            # (tm, 1) int32
    tm = ids.shape[0]
    vtab = fused_ref.shape[0]
    onehot = jnp.where(
        lax.broadcasted_iota(jnp.int32, (tm, vtab), 1) == ids, 1.0, 0.0
    ).astype(jnp.float32)                                         # (tm, Vtab)
    return jnp.dot(onehot, fused_ref[...], preferred_element_type=jnp.float32)


def _logits_kernel(idx_ref, fused_ref, logits_ref):
    logits_ref[...] = _select_logits(idx_ref, fused_ref)


def _logits_ce_kernel(idx_ref, fused_ref, tgt_ref, logits_ref, ce_ref):
    logits = _select_logits(idx_ref, fused_ref)                   # (tm, Vpad) f32
    logits_ref[...] = logits

    # Stable logsumexp; padded vocab columns carry ~-1e30 and underflow to exp(.) = 0.
    m = jnp.max(logits, axis=-1, keepdims=True)
    lse = m + jnp.log(jnp.sum(jnp.exp(logits - m), axis=-1, keepdims=True))

    # Targets must lie in [0, vocab_size); -1 marks padded rows.  Out-of-range targets
    # would silently select 0 here (documented correctness caveat).
    tgt = tgt_ref[...]                                            # (tm, 1) int32
    col = lax.broadcasted_iota(jnp.int32, logits.shape, 1)
    tgt_logit = jnp.sum(jnp.where(col == tgt, logits, 0.0), axis=-1, keepdims=True)
    ce_rows = jnp.where(tgt >= 0, lse - tgt_logit, 0.0)           # padded rows -> 0

    # Per-tile partial sum only (one (8,1) block, 32 B writeback) instead of a
    # lane-sparse per-row (tm,1) slab; the grid partials are summed outside.
    part = jnp.sum(ce_rows)
    row = lax.broadcasted_iota(jnp.int32, (_SUBLANE, 1), 0)
    ce_ref[...] = jnp.where(row == 0, part, 0.0)


# ----------------------------- pallas_call wrappers --------------------------
def _common_specs(tm, vtab, vpad):
    return [
        pl.BlockSpec((tm, 1), lambda i: (i, 0)),          # token ids slab
        pl.BlockSpec((vtab, vpad), lambda i: (0, 0)),     # fused logit table (resident)
    ]


@jax.jit
def _forward_infer(fused_table, idx):
    B, T = idx.shape
    M = B * T
    vtab, vpad = fused_table.shape
    tm, n_tiles = _pick_tile(M, vpad)
    m_pad = tm * n_tiles
    idx2d = jnp.pad(idx.reshape(M).astype(jnp.int32), (0, m_pad - M)).reshape(m_pad, 1)

    cost = pl.CostEstimate(
        flops=2 * m_pad * vtab * vpad,
        transcendentals=0,
        bytes_accessed=m_pad * 4 + vtab * vpad * 4 + m_pad * vpad * 4)

    logits_pad = pl.pallas_call(
        _logits_kernel,
        out_shape=jax.ShapeDtypeStruct((m_pad, vpad), jnp.float32),
        grid_spec=pltpu.PrefetchScalarGridSpec(
            num_scalar_prefetch=0,
            grid=(n_tiles,),
            in_specs=_common_specs(tm, vtab, vpad),
            out_specs=pl.BlockSpec((tm, vpad), lambda i: (i, 0)),
        ),
        compiler_params=pltpu.CompilerParams(
            dimension_semantics=("parallel",),            # no cross-step state
            vmem_limit_bytes=_vmem_limit_bytes(tm, vpad, vtab),
        ),
        cost_estimate=cost,
    )(idx2d, fused_table)
    return logits_pad[:M, :cfg.vocab_size].reshape(B, T, cfg.vocab_size)


@jax.jit
def _forward_train(fused_table, idx, targets):
    B, T = idx.shape
    M = B * T
    vtab, vpad = fused_table.shape
    tm, n_tiles = _pick_tile(M, vpad)
    m_pad = tm * n_tiles
    idx2d = jnp.pad(idx.reshape(M).astype(jnp.int32), (0, m_pad - M)).reshape(m_pad, 1)
    tgt2d = jnp.pad(targets.reshape(M).astype(jnp.int32), (0, m_pad - M),
                    constant_values=-1).reshape(m_pad, 1)

    cost = pl.CostEstimate(
        flops=2 * m_pad * vtab * vpad,
        transcendentals=m_pad * (vpad + 1),
        bytes_accessed=(2 * m_pad * 4 + vtab * vpad * 4
                        + m_pad * vpad * 4 + n_tiles * _SUBLANE * 4))

    logits_pad, ce_parts = pl.pallas_call(
        _logits_ce_kernel,
        out_shape=(jax.ShapeDtypeStruct((m_pad, vpad), jnp.float32),
                   jax.ShapeDtypeStruct((n_tiles * _SUBLANE, 1), jnp.float32)),
        grid_spec=pltpu.PrefetchScalarGridSpec(
            num_scalar_prefetch=0,
            grid=(n_tiles,),
            in_specs=_common_specs(tm, vtab, vpad)
                     + [pl.BlockSpec((tm, 1), lambda i: (i, 0))],     # targets slab
            out_specs=[pl.BlockSpec((tm, vpad), lambda i: (i, 0)),
                       pl.BlockSpec((_SUBLANE, 1), lambda i: (i, 0))],
        ),
        compiler_params=pltpu.CompilerParams(
            dimension_semantics=("parallel",),
            vmem_limit_bytes=_vmem_limit_bytes(tm, vpad, vtab),
        ),
        cost_estimate=cost,
    )(idx2d, fused_table, tgt2d)

    logits = logits_pad[:M, :cfg.vocab_size]          # (B*T, V), matches PyTorch .view
    loss = jnp.sum(ce_parts) / jnp.float32(M)         # padded rows / extra sublanes are 0
    return logits, loss


# ----------------------------- model wrapper ---------------------------------
def init_params(key):
    k_tok, k_pos, k_w, k_b = jax.random.split(key, 4)
    C, V, BS = cfg.n_embd, cfg.vocab_size, cfg.blocksize
    token_table = jax.random.normal(k_tok, (V, C), dtype=jnp.float32)   # nn.Embedding ~ N(0,1)
    pos_table = jax.random.normal(k_pos, (BS, C), dtype=jnp.float32)    # DEAD in forward (x unused)
    bound = 1.0 / jnp.sqrt(jnp.float32(C))
    w = jax.random.uniform(k_w, (C, V), jnp.float32, -bound, bound)     # Linear weight, transposed
    b = jax.random.uniform(k_b, (1, V), jnp.float32, -bound, bound)
    return dict(token_table=token_table, pos_table=pos_table, w=w, b=b)


def prepare_params(params):
    """One-time prep (hoisted out of the forward): fused logit table (V, Vpad) f32.

    logits = table[idx] @ W + b == fused[idx]   with   fused = table @ W + b.
    Padded vocab columns carry bias -1e30 so they vanish from the logsumexp and can
    never match a target; callers always slice [:, :V] before returning logits.
    """
    C, V = params["w"].shape
    vpad = _round_up(V, _LANE)
    w_pad = jnp.zeros((C, vpad), jnp.float32).at[:, :V].set(params["w"])
    b_pad = jnp.full((1, vpad), _NEG_INF, jnp.float32).at[:, :V].set(params["b"])
    fused = jnp.dot(params["token_table"], w_pad,
                    preferred_element_type=jnp.float32,
                    precision=jax.lax.Precision.HIGHEST) + b_pad         # (V, Vpad) f32
    return fused


def faber_gpt_forward(fused_table, idx, targets=None):
    """Matches PyTorch FaberGPT.forward:
       targets=None -> ((B, T, V) logits, None)
       else         -> ((B*T, V) logits, scalar mean cross-entropy).
    Targets must lie in [0, vocab_size)."""
    if targets is None:
        return _forward_infer(fused_table, idx), None
    return _forward_train(fused_table, idx, targets)


# ----------------------------- main ------------------------------------------
if __name__ == "__main__":
    key = jax.random.PRNGKey(0)
    k_params, k_idx, k_tgt = jax.random.split(key, 3)

    params = init_params(k_params)
    fused_table = prepare_params(params)            # one-time param prep (hoisted)

    B, T = 2, 8
    idx = jax.random.randint(k_idx, (B, T), 0, cfg.vocab_size, dtype=jnp.int32)
    targets = jax.random.randint(k_tgt, (B, T), 0, cfg.vocab_size, dtype=jnp.int32)

    logits, loss = faber_gpt_forward(fused_table, idx, targets)
    logits_inf, loss_none = faber_gpt_forward(fused_table, idx, None)
    logits, loss, logits_inf = jax.block_until_ready((logits, loss, logits_inf))

    # --- pure-JAX f32 reference ---
    M, V, C = B * T, cfg.vocab_size, cfg.n_embd
    tok_ref = params["token_table"][idx.reshape(M)]
    ref_logits = jnp.dot(tok_ref, params["w"], preferred_element_type=jnp.float32,
                         precision=jax.lax.Precision.HIGHEST) + params["b"]
    tf = targets.reshape(M)
    ref_loss = jnp.mean(jax.scipy.special.logsumexp(ref_logits, axis=-1)
                        - ref_logits[jnp.arange(M), tf])

    assert logits.shape == (M, V)
    assert loss_none is None and logits_inf.shape == (B, T, V)
    assert jnp.allclose(logits, ref_logits, atol=2e-3, rtol=2e-3)
    assert jnp.allclose(logits_inf.reshape(M, V), ref_logits, atol=2e-3, rtol=2e-3)
    assert jnp.allclose(loss, ref_loss, atol=2e-3, rtol=2e-3)

    print("KERNEL_OK")
</pallas_src>

<mosaic_0001>
module attributes {stable_mosaic.version = 11 : i64} {
  func.func @_logits_ce_kernel(%arg0: i32, %arg1: memref<8x1xi32, #tpu.memory_space<vmem>>, %arg2: memref<64x128xf32, #tpu.memory_space<vmem>>, %arg3: memref<8x1xi32, #tpu.memory_space<vmem>>, %arg4: memref<8x128xf32, #tpu.memory_space<vmem>>, %arg5: memref<8x1xf32, #tpu.memory_space<vmem>>) attributes {dimension_semantics = [#tpu.dimension_semantics<parallel>], iteration_bounds = array<i64: 2>, scalar_prefetch = 0 : i64, scratch_operands = 0 : i64, tpu.core_type = #tpu.core_type<tc>, window_params = [{transform_indices = @transform_0, window_bounds = array<i64: 8, 1>}, {pipeline_mode = #tpu.pipeline_mode<synchronous>, transform_indices = @transform_1, window_bounds = array<i64: 64, 128>}, {transform_indices = @transform_2, window_bounds = array<i64: 8, 1>}, {transform_indices = @transform_3, window_bounds = array<i64: 8, 128>}, {transform_indices = @transform_4, window_bounds = array<i64: 8, 1>}]} {
    %c0 = arith.constant 0 : index
    %c0_0 = arith.constant 0 : index
    %0 = vector.load %arg1[%c0, %c0_0] : memref<8x1xi32, #tpu.memory_space<vmem>>, vector<8x1xi32>
    %1 = tpu.iota {dimensions = array<i32: 1>} : vector<8x64xi32>
    %2 = vector.broadcast %0 : vector<8x1xi32> to vector<8x64xi32>
    %3 = arith.cmpi eq, %1, %2 : vector<8x64xi32>
    %cst = arith.constant 1.000000e+00 : f32
    %cst_1 = arith.constant 0.000000e+00 : f32
    %4 = vector.broadcast %cst : f32 to vector<8x64xf32>
    %5 = vector.broadcast %cst_1 : f32 to vector<8x64xf32>
    %6 = arith.select %3, %4, %5 : vector<8x64xi1>, vector<8x64xf32>
    %c0_2 = arith.constant 0 : index
    %c0_3 = arith.constant 0 : index
    %7 = vector.load %arg2[%c0_2, %c0_3] : memref<64x128xf32, #tpu.memory_space<vmem>>, vector<64x128xf32>
    %cst_4 = arith.constant dense<0.000000e+00> : vector<8x128xf32>
    %8 = tpu.matmul %6, %7, %cst_4 {dimension_numbers = #tpu.dot_dimension_numbers<[1], [0], [0], [1], [0, 0, 1, 1], [], []>} : vector<8x64xf32>, vector<64x128xf32>, vector<8x128xf32> -> vector<8x128xf32>
    %c0_5 = arith.constant 0 : index
    %c0_6 = arith.constant 0 : index
    %9 = vector.load %arg4[%c0_5, %c0_6] : memref<8x128xf32, #tpu.memory_space<vmem>>, vector<8x128xf32>
    tpu.vector_store %arg4[%c0_5, %c0_6], %8 {strides = array<i32>} : memref<8x128xf32, #tpu.memory_space<vmem>>, vector<8x128xf32>,
    %cst_7 = arith.constant dense<0xFF800000> : vector<8xf32>
    %10 = vector.multi_reduction <maximumf>, %8, %cst_7 [1] : vector<8x128xf32> to vector<8xf32>
    %11 = vector.shape_cast %10 : vector<8xf32> to vector<8x1xf32>
    %12 = vector.broadcast %11 : vector<8x1xf32> to vector<8x128xf32>
    %13 = arith.subf %8, %12 : vector<8x128xf32>
    %14 = math.exp %13 : vector<8x128xf32>
    %cst_8 = arith.constant dense<0.000000e+00> : vector<8xf32>
    %15 = vector.multi_reduction <add>, %14, %cst_8 [1] : vector<8x128xf32> to vector<8xf32>
    %16 = vector.shape_cast %15 : vector<8xf32> to vector<8x1xf32>
    %17 = math.log %16 : vector<8x1xf32>
    %18 = arith.addf %11, %17 : vector<8x1xf32>
    %c0_9 = arith.constant 0 : index
    %c0_10 = arith.constant 0 : index
    %19 = vector.load %arg3[%c0_9, %c0_10] : memref<8x1xi32, #tpu.memory_space<vmem>>, vector<8x1xi32>
    %20 = tpu.iota {dimensions = array<i32: 1>} : vector<8x128xi32>
    %21 = vector.broadcast %19 : vector<8x1xi32> to vector<8x128xi32>
    %22 = arith.cmpi eq, %20, %21 : vector<8x128xi32>
    %cst_11 = arith.constant 0.000000e+00 : f32
    %23 = vector.broadcast %cst_11 : f32 to vector<8x128xf32>
    %24 = arith.select %22, %8, %23 : vector<8x128xi1>, vector<8x128xf32>
    %cst_12 = arith.constant dense<0.000000e+00> : vector<8xf32>
    %25 = vector.multi_reduction <add>, %24, %cst_12 [1] : vector<8x128xf32> to vector<8xf32>
    %26 = vector.shape_cast %25 : vector<8xf32> to vector<8x1xf32>
    %c0_i32 = arith.constant 0 : i32
    %27 = vector.broadcast %c0_i32 : i32 to vector<8x1xi32>
    %28 = arith.cmpi sge, %19, %27 : vector<8x1xi32>
    %29 = arith.subf %18, %26 : vector<8x1xf32>
    %cst_13 = arith.constant 0.000000e+00 : f32
    %30 = vector.broadcast %cst_13 : f32 to vector<8x1xf32>
    %31 = arith.select %28, %29, %30 : vector<8x1xi1>, vector<8x1xf32>
    %32 = vector.shape_cast %31 : vector<8x1xf32> to vector<1x8x1xf32>
    %cst_14 = arith.constant dense<0.000000e+00> : vector<1xf32>
    %33 = vector.multi_reduction <add>, %32, %cst_14 [1, 2] : vector<1x8x1xf32> to vector<1xf32>
    %34 = vector.shape_cast %33 : vector<1xf32> to vector<1x1x1xf32>
    %35 = vector.extract %34[0, 0, 0] : f32 from vector<1x1x1xf32>
    %36 = tpu.iota {dimensions = array<i32: 0>} : vector<8x1xi32>
    %c0_i32_15 = arith.constant 0 : i32
    %37 = vector.broadcast %c0_i32_15 : i32 to vector<8x1xi32>
    %38 = arith.cmpi eq, %36, %37 : vector<8x1xi32>
    %cst_16 = arith.constant 0.000000e+00 : f32
    %39 = vector.broadcast %35 : f32 to vector<8x1xf32>
    %40 = vector.broadcast %cst_16 : f32 to vector<8x1xf32>
    %41 = arith.select %38, %39, %40 : vector<8x1xi1>, vector<8x1xf32>
    %c0_17 = arith.constant 0 : index
    %c0_18 = arith.constant 0 : index
    %42 = vector.load %arg5[%c0_17, %c0_18] : memref<8x1xf32, #tpu.memory_space<vmem>>, vector<8x1xf32>
    tpu.vector_store %arg5[%c0_17, %c0_18], %41 {strides = array<i32>} : memref<8x1xf32, #tpu.memory_space<vmem>>, vector<8x1xf32>,
    return
  }
  func.func @transform_0(%arg0: i32) -> (i32, i32) {
    %c0_i32 = arith.constant 0 : i32
    %c0_i32_0 = arith.constant 0 : i32
    return %arg0, %c0_i32 : i32, i32
  }
  func.func @transform_1(%arg0: i32) -> (i32, i32) {
    %c0_i32 = arith.constant 0 : i32
    %c0_i32_0 = arith.constant 0 : i32
    %c0_i32_1 = arith.constant 0 : i32
    return %c0_i32, %c0_i32_0 : i32, i32
  }
  func.func @transform_2(%arg0: i32) -> (i32, i32) {
    %c0_i32 = arith.constant 0 : i32
    %c0_i32_0 = arith.constant 0 : i32
    return %arg0, %c0_i32 : i32, i32
  }
  func.func @transform_3(%arg0: i32) -> (i32, i32) {
    %c0_i32 = arith.constant 0 : i32
    %c0_i32_0 = arith.constant 0 : i32
    return %arg0, %c0_i32 : i32, i32
  }
  func.func @transform_4(%arg0: i32) -> (i32, i32) {
    %c0_i32 = arith.constant 0 : i32
    %c0_i32_0 = arith.constant 0 : i32
    return %arg0, %c0_i32 : i32, i32
  }
}

</mosaic_0001>

<bundles_post_ra>
// kernel: _forward_train.1
= control target key start
LH: loop header
LB: loop body
LE: loop exit
PB: predicated region body
PF: predicated region fallthrough
CT: control target
= control target key end

     0   :  { %10 = vsyncpa [#allocation3], 0  ;;  %s889_s0 = inlined_call_operand.vmem [shape: s32[16,1], index: 0, kind: input, shape index: {}]   ;;  %s890_s1 = inlined_call_operand.hbm [shape: f32[64,128], index: 1, kind: input, shape index: {}]   ;;  %s891_s2 = inlined_call_operand.vmem [shape: s32[16,1], index: 2, kind: input, shape index: {}]   ;;  %s892_s3 = inlined_call_operand.hbm [shape: f32[16,128], index: 3, kind: output, shape index: {0}]   ;;  %s893_s4 = inlined_call_operand.vmem [shape: f32[16,1], index: 4, kind: output, shape index: {1}]  }
   0x1   :  { %11 = vsyncpa [#allocation4], 0 }
   0x2   :  { %13 = vsyncpa [#allocation4 + $0x1], 0  ;;  %s741_s15 = smov 0   ;;  %s743_s16 = smov 0  }
   0x3   :  { %s745_s17 = smov 0   ;;  %s747_s18 = smov 0  }
   0x4 LB: > { %s762_s19 = sadd.s32 4294967295, %s706_s18   ;;  %s493_s20 = sadd.s32 4294967294, %s706_s18   ;;  %s706_s18 = sphi %s747_s18, %s909_s18   ;;  %s702_s17 = sphi %s745_s17, %s908_s17   ;;  %s698_s16 = sphi %s743_s16, %s907_s16   ;;  %s694_s15 = sphi %s741_s15, %s906_s15  }
   0x5   : > { %s766_s21 = sadd.s32 1, %s706_s18   ;;  %s99_s22 = sadd.s32 1, %s702_s17 }
   0x6   : > { %s96_s23 = ssub.s32 %s706_s18, %s766_s21  ;;  %p109_p0 = scmp.ne.s32.totalorder %s702_s17, %s698_s16 }
   0x7   : > { %p97_p1 = scmp.eq.s32.totalorder %s96_s23, 0  ;;  %p110_p2 = scmp.eq.s32.totalorder %s762_s19, 1 }
   0x8   : > { %p115_p3 = scmp.ne.s32.totalorder %s698_s16, %s694_s15  ;;  %p116_p4 = scmp.eq.s32.totalorder %s493_s20, 1 }
   0x9   : > { %s777_s24 = scalar_select %p97_p1, %s702_s17, %s99_s22  }
   0xa   : > { %p779_p5 = por %p110_p2, %p109_p0  ;;  %p783_p6 = por %p116_p4, %p115_p3 }
   0xb   : > { %p494_p7 = scmp.ge.s32.totalorder %s706_s18, 1  ;;  %p149_p8 = scmp.lt.s32.totalorder %s706_s18, 3 }
   0xc   : > { %s897_s25 = scalar_select %p779_p5, 1, 0 }
   0xd   : > { %s898_s26 = scalar_select %p783_p6, 1, 0 }
   0xe   : > { %p894_p9 = scmp.eq.s32.totalorder %s762_s19, 0  ;;  %p790_p10 = pnand %p494_p7, %p149_p8 }
   0xf   : > { %s708_s28 = smov [#allocation2]   ;;  %s612_s7 = scalar_lea.hbm %s890_s1, 1024 }
  0x10   : > { %s899_s27 = scalar_select %p790_p10, 1, 0 }
  0x11   : > { %s161_s29 = sshll.u32 %s708_s28, 4  ;;  %p556_p11 = pneg %p790_p10  ;;  %s162_s29 = int_to_ptr.vmem [resolvable:$true] %s161_s29 }
  0x12   : > { %p613_p13 = scmp.ne.s32.totalorder %s890_s1, %s612_s7  ;;  %p619_p3 = scmp.lt.u32.totalorder %s612_s7, %s890_s1 }
  0x13   : > { %p798_p12 = pnand %p894_p9, %p556_p11 }
  0x15   : > { %p614_p0 = pneg %p798_p12 }
  0x17   : > { %p615_p1 = pnand %p614_p0, %p613_p13 }
  0x19   : > { %p616_p2 = pneg %p615_p1 }
  0x1b   : > { %p621_p4 = pnand %p619_p3, %p616_p2 }
  0x1d   : > { %624 = shalt.err (!%p621_p4)
}
  0x1e   : > { %s625_s12 = scalar_lea.vmem %s162_s29, 1024  ;;  %p633_p9 = scmp.lt.s32.totalorder %s162_s29, %s162_s29 }
  0x1f   : > { %p626_p7 = scmp.ne.s32.totalorder %s162_s29, %s625_s12  ;;  %p634_p6 = scmp.lt.s32.totalorder %s625_s12, %s625_s12 }
  0x21   : > { %p628_p8 = pnand %p626_p7, %p614_p0  ;;  %p635_p5 = por %p634_p6, %p633_p9 }
  0x23   : > { %p629_p11 = pneg %p628_p8 }
  0x25   : > { %p636_p10 = pnand %p635_p5, %p629_p11 }
  0x27   : > { %639 = shalt.err (!%p636_p10)
}
  0x28   : > { %s709_s13 = smov 128   ;;  %s710_s14 = smov 8  }
  0x29   : > { %559 = dma.hbm_to_vmem [thread:$0]  (!%p798_p12), %s890_s1, 1024, %s162_s29, [#allocation3], %s709_s13, %s709_s13, %s710_s14  }
  0x2a   : > { %p901_p13 = scmp.ne.s32.totalorder %s899_s27, 0 }
  0x2b   : > { %p902_p1 = scmp.eq.s32.totalorder (!%p901_p13), %s762_s19, 0 }
  0x2c   : > { %191 = sbr.rel (%p901_p13) target bundleno = 926 (0x39e), region = 32 }
  0x33   : > { %685 = dma.done.wait (%p902_p1), [#allocation3], 1024   ;;  %p903_p0 = pmov %p902_p1 }
  0x34   : > { %p224_p5 = scmp.lt.s32.totalorder %s762_s19, 1  ;;  %v711_v0 = vmov 0   ;;  %v712_v1 = vmov 0.0|0.0   ;;  %v244_v3 = vld [vmem:[#allocation2] sm:$0xff]  ;;  %v245_v4 = vld [vmem:[#allocation2 + $0x8] sm:$0xff]  ;;  %v246_v6 = vld [vmem:[#allocation2 + $0x10] sm:$0xff]  ;;  %v237_v17 = vlaneseq }
  0x35   : > { %687 = vsyncadd (%p903_p0), [#allocation3], 4294966272  ;;  %606 = vset.pattern.permute.xlu0 %v711_v0  ;;  %536 = vmatprep.subr.bf16.mxu0 %v712_v1  ;;  %v537_v5 = vpack.c.bf16 %v245_v4, %v244_v3  ;;  %v247_v7 = vld [vmem:[#allocation2 + $0x18] sm:$0xff]  ;;  %vm713_vm0 = vmmov 0   ;;  %v714_v8 = vmov 0.0   ;;  %v248_v10 = vld [vmem:[#allocation2 + $0x20] sm:$0xff] }
  0x36   : > { %s225_s23 = scalar_select %p224_p5, %s762_s19, 1  ;;  %607 = vset.pattern.permute.xlu1 %v711_v0  ;;  %533 = vmatprep.mubr.msk.f32.mxu0 %vm713_vm0, %v714_v8  ;;  %v540_v9 = vpack.c.bf16 %v247_v7, %v246_v6  ;;  %v249_v11 = vld [vmem:[#allocation2 + $0x28] sm:$0xff]  ;;  %v250_v14 = vld [vmem:[#allocation2 + $0x30] sm:$0xff]  ;;  %v251_v15 = vld [vmem:[#allocation2 + $0x38] sm:$0xff]  ;;  %v238_v18 = vand.u32 127, %v237_v17  ;;  %vm252_vm1 = vcmask 523264  }
  0x37   : > { %538 = vmatpush3.bf16.msra.mxu0 %v537_v5  ;;  %v543_v13 = vpack.c.bf16 %v249_v11, %v248_v10  ;;  %v546_v16 = vpack.c.bf16 %v251_v15, %v250_v14  ;;  %s215_s8 = sand.u32 1, %s698_s16   ;;  %vm348_vm5 = vcmask 7168   ;;  %s505_s11 = sshll.u32 %s762_s19, 7 }
  0x38   : > { %s826_s28 = sshll.u32 %s225_s23, 3  ;;  %539 = vmatprep.subr.bf16.mxu0 %v712_v1  ;;  %s499_s9 = sshll.u32 %s215_s8, 3 }
  0x39   : > { %s227_s30 = scalar_lea.vmem %s889_s0, %s826_s28  ;;  %s231_s7 = scalar_lea.vmem %s891_s2, %s826_s28 }
  0x3a   : > { %v236_v2 = vld [vmem:[%s227_s30] sm:$0xff]  ;;  %s217_s10 = scalar_lea.vmem [#allocation5], %s499_s9  ;;  %s845_s20 = scalar_lea.hbm %s892_s3, %s505_s11 }
  0x3b   : > { %240 = vperm.xlu0 %606, %v236_v2   ;;  %v337_v12 = vld [vmem:[%s231_s7] sm:$0xff]  ;;  %541 = vmatpush3.bf16.msra.mxu0 %v540_v9  ;;  %s383_s12 = sshll.u32 %s217_s10, 4  ;;  %s366_s22 = scalar_lea.sflag [#allocation4], %s215_s8  ;;  %s384_s12 = int_to_ptr.vmem [resolvable:$true] %s383_s12 }
  0x3c   : > { %339 = vperm.xlu1 %607, %v337_v12   ;;  %542 = vmatprep.subr.bf16.mxu0 %v712_v1  ;;  %vm345_vm4 = vcmp.ge.s32.totalorder %v337_v12, 0  ;;  %s640_s23 = scalar_lea.vmem %s384_s12, 128  ;;  %p904_p9 = scmp.ne.s32.totalorder %s897_s25, 0 }
  0x3d   : > { %p641_p6 = scmp.ne.s32.totalorder %s384_s12, %s640_s23  ;;  %s715_s27 = smov [#allocation5]  }
  0x3e   : > { %s644_s29 = sshll.u32 %s715_s27, 4  ;;  %s645_s29 = int_to_ptr.vmem [resolvable:$false] %s644_s29 }
  0x3f   : > { %544 = vmatpush3.bf16.msra.mxu0 %v543_v13  ;;  %p642_p10 = pnand %p641_p6, %p904_p9  ;;  %s646_s30 = scalar_lea.vmem %s645_s29, 256 }
  0x40   : > { %545 = vmatprep.subr.bf16.mxu0 %v712_v1  ;;  %p647_p2 = scmp.lt.s32.totalorder %s384_s12, %s645_s29  ;;  %p648_p3 = scmp.lt.s32.totalorder %s646_s30, %s640_s23 }
  0x41   : > { %p643_p12 = pneg %p642_p10 }
  0x42   : > { %p649_p4 = por %p648_p3, %p647_p2 }
  0x43   : > { %547 = vmatpush3.bf16.msra.mxu0 %v546_v16 }
  0x44   : > { %p650_p7 = pnand %p649_p4, %p643_p12 }
  0xba   : > { %v241_v19 = vpop.permute.xlu0 %240 }
  0xbb   : > { %vm242_vm2 = vcmp.eq.s32.totalorder %v238_v18, %v241_v19  ;;  %v340_v21 = vpop.permute.xlu1 %339 }
  0xbc   : > { %v243_v20 = vsel %vm242_vm2, 1.0, %v714_v8  ;;  %vm341_vm3 = vcmp.eq.s32.totalorder %v238_v18, %v340_v21 }
  0xbd   : > { %534 = vmatmul.mubr.msk.f32.vlgmr.msra.gmra.mrb[0].mxu0 %vm252_vm1, %v243_v20 }
 0x190   : > { %v322_v22 = vpop.f32.mrb[0].mxu0 }
 0x191   : > { %327 = vmax.xlane.f32.xlu0 %v322_v22  ;;  %v535_v23 = vpop.f32.mrb[1].mxu0  ;;  %v342_v24 = vsel %vm341_vm3, %v322_v22, 0.0  ;;  %326 = vst [vmem:[%s217_s10] sm:$0xff] %v322_v22 }
 0x195   : > { %343 = vadd.xlane.f32.xlu0 %v342_v24 }
 0x21e   : > { %v328_v25 = vpop.xlane.xlu0 %327 }
 0x21f   : > { %v329_v26 = vsub.f32 %v322_v22, %v328_v25 }
 0x221   : > { %v330_v27 = vmul.f32 1.442695, %v329_v26 }
 0x222   : > { %v344_v33 = vpop.xlane.xlu0 %343 }
 0x223   : > { %608 = vpow2.f32 %v330_v27 }
 0x22d   : > { %v609_v28 = vpop.eup %608 }
 0x22e   : > { %332 = vadd.xlane.f32.xlu1 %v609_v28 }
 0x2bb   : > { %v333_v29 = vpop.xlane.xlu1 %332 }
 0x2bc   : > { %610 = vlog2.f32 %v333_v29 }
 0x2c6   : > { %v611_v30 = vpop.eup %610 }
 0x2c7   : > { %v335_v31 = vmul.f32 0.6931472, %v611_v30 }
 0x2c9   : > { %v336_v32 = vadd.f32 %v335_v31, %v328_v25 }
 0x2cb   : > { %v346_v34 = vsub.f32 %v336_v32, %v344_v33 }
 0x2cd   : > { %v347_v35 = vsel %vm345_vm4, %v346_v34, 0.0 }
 0x2ce   : > { %v349_v36 = vsel %vm348_vm5, %v347_v35, 0.0 }
 0x2cf   : > { %350 = vadd.xlane.f32.xlu0 %v349_v36 }
 0x2d0   : > { %653 = shalt.err (!%p650_p7)
}
 0x2d1   : > { %s654_s19 = scalar_lea.hbm %s845_s20, 128  ;;  %s658_s7 = scalar_lea.hbm %s892_s3, 256 }
 0x2d2   : > { %p655_p8 = scmp.ne.s32.totalorder %s845_s20, %s654_s19  ;;  %p659_p1 = scmp.lt.u32.totalorder %s845_s20, %s892_s3 }
 0x2d3   : > { %p660_p0 = scmp.lt.u32.totalorder %s658_s7, %s654_s19  ;;  %p662_p6 = scmp.lt.u32.totalorder %s654_s19, %s845_s20 }
 0x2d4   : > { %p656_p11 = pnand %p655_p8, %p904_p9 }
 0x2d5   : > { %p661_p5 = por %p660_p0, %p659_p1 }
 0x2d6   : > { %p657_p13 = pneg %p656_p11 }
 0x2d7   : > { %p663_p10 = por %p662_p6, %p661_p5 }
 0x2d9   : > { %p664_p12 = pnand %p663_p10, %p657_p13 }
 0x2db   : > { %667 = shalt.err (!%p664_p12)
}
 0x2dc   : > { %554 = dma.vmem_to_hbm [thread:$0]  (%p904_p9), %s384_s12, 128, %s845_s20, %s366_s22   ;;  %v360_v44 = vshrl.u32 %v237_v17, 7 }
 0x2dd   : > { %s235_s13 = scalar_lea.vmem %s893_s4, %s826_s28 }
 0x2de   : > { %vm361_vm6 = vcmp.eq.s32.totalorder %v360_v44, 0 }
 0x35c   : > { %v351_v37 = vpop.xlane.xlu0 %350 }
 0x35d   : > { %v352_v38 = vrot.slane %v351_v37, 4 }
 0x35f   : > { %v353_v39 = vadd.f32 %v352_v38, %v351_v37 }
 0x361   : > { %v354_v40 = vrot.slane %v353_v39, 2 }
 0x363   : > { %v355_v41 = vadd.f32 %v354_v40, %v353_v39 }
 0x365   : > { %v356_v42 = vrot.slane %v355_v41, 1 }
 0x367   : > { %v357_v43 = vadd.f32 %v356_v42, %v355_v41 }
 0x369   : > { %548 = vpush %v357_v43 }
 0x39a   : > { %s549_s14 = spop %548 }
 0x39b   : > { %v362_v45 = vstv %s549_s14 }
 0x39c   : > { %v363_v46 = vsel %vm361_vm6, %v362_v45, 0.0 }
 0x39d   : > { %364 = vst.msk [vmem:[%s235_s13] sm:$0xff] %vm348_vm5, %v363_v46 }
 0x39e PF: > { %p566_p9 = scmp.ge.s32.totalorder %s706_s18, 2  ;;  %s398_s25 = sand.u32 1, %s694_s15  }
 0x39f   : > { %p905_p2 = scmp.ne.s32.totalorder %s898_s26, 0  ;;  %s399_s12 = scalar_lea.sflag [#allocation4], %s398_s25 }
 0x3a1   : > { %p561_p3 = pnand %p566_p9, %p905_p2 }
 0x3a3   : > { %689 = dma.done.wait (!%p561_p3), %s399_s12, 128  }
 0x3a4   : > { %691 = vsyncadd (!%p561_p3), %s399_s12, 4294967168  ;;  %p16_p4 = scmp.ge.s32.totalorder %s766_s21, 4   ;;  %s906_s15 = smov %s698_s16 }
 0x3a5   : > { %s907_s16 = smov %s702_s17  ;;  %s908_s17 = smov %s777_s24 }
 0x3a6   : > { %s909_s18 = smov %s766_s21  ;;  %18 = sbr.rel (!%p16_p4) target bundleno = 4 (0x4), region = 87 }
 0x3ad   :  { %411 = vsyncpa [#allocation3], 1 }
 0x3ae   :  { %413 = vsyncpa [#allocation3 + $0x1], 1 }
 0x3af   :  { %414 = vsyncpa [#allocation4], 1 }
 0x3b0   :  { %416 = vsyncpa [#allocation4 + $0x1], 1 }

</bundles_post_ra>
